<compile_context>
chip_gen: v5e
topology: v5e:2x2
jax: 0.10.0
libtpu: 0.0.40
codegen_flags: <defaults>
</compile_context>

<pallas_src>
import functools

import jax
import jax.numpy as jnp
from jax import lax
from jax.experimental import pallas as pl
from jax.experimental.pallas import tpu as pltpu


def _hinge_squared_kernel(x_ref, t_ref, o_ref, *, n_cols, tile_n, tiles_per_split):
    p = pl.program_id(0)
    j = pl.program_id(1)

    @pl.when(j == 0)
    def _init():
        o_ref[0, 0] = jnp.float32(0.0)

    x = x_ref[...].astype(jnp.float32)                 # [C, TILE_N], upcast in-kernel
    t = t_ref[...]                                     # [1, TILE_N] int32
    C, TN = x.shape
    cls = lax.broadcasted_iota(jnp.int32, (C, TN), 0)
    # Fused hinge: y = +1 on the target row else -1, so
    #   0.5 - y*x == where(cls == target, 0.5 - x, 0.5 + x)
    h = jnp.maximum(jnp.where(cls == t, 0.5 - x, 0.5 + x), 0.0)
    sq = h * h

    # Ragged-tail / clamped-tile mask.  col is computed from the *logical*
    # tile index (unclamped), so tiles that were clamped in the index_map
    # contribute exactly zero.  Select (where), not multiply: tail lanes hold
    # undefined data that may be NaN/Inf.
    col0 = (p * tiles_per_split + j) * tile_n
    col = col0 + lax.broadcasted_iota(jnp.int32, (1, TN), 1)
    sq = jnp.where(col < n_cols, sq, 0.0)

    # Per-step full reduce on the XLU (free slot in a mem-bound kernel),
    # accumulated into the resident SMEM output scalar.
    o_ref[0, 0] += jnp.sum(sq)


def _default_num_splits() -> int:
    """One grid split per TensorCore the 'parallel' axis can use.

    Mis-detection is safe: any value is correct, only mildly suboptimal.
    """
    try:
        kind = jax.devices()[0].device_kind.lower()
    except Exception:
        return 1
    if "lite" in kind or "v5e" in kind or "v6" in kind:
        return 1                     # single TensorCore (v5e / v6e)
    if "v7" in kind or "v4" in kind or "v5p" in kind:
        return 2                     # 2 TensorCores per Pallas-visible device
    return 1


def hinge_squared(inputs: jax.Array, target: jax.Array,
                  *, tile_n: int = 16384, num_splits: int | None = None) -> jax.Array:
    """inputs: [C, N] float32/bfloat16, target: [N] integer class ids.

    Returns the scalar squared-hinge loss (float32).
    """
    C, N = inputs.shape
    LANE = 128
    if num_splits is None:
        num_splits = _default_num_splits()

    # Lane-aligned tile, no bigger than the (lane-rounded) problem.
    n_lane = -(-N // LANE) * LANE
    tile_n = max(LANE, min(int(tile_n), n_lane))
    tile_n = -(-tile_n // LANE) * LANE

    total_tiles = -(-N // tile_n)                       # cdiv; last tile may be partial
    num_splits = max(1, min(int(num_splits), total_tiles))
    tiles_per_split = -(-total_tiles // num_splits)
    last_tile = total_tiles - 1

    target2d = target.astype(jnp.int32).reshape(1, N)

    def idx_map(p, j):
        # Clamp so no block is fully out of bounds; the kernel's column mask
        # (based on the unclamped logical index) zeroes clamped tiles.
        return (0, jnp.minimum(p * tiles_per_split + j, last_tile))

    kernel = functools.partial(
        _hinge_squared_kernel,
        n_cols=N, tile_n=tile_n, tiles_per_split=tiles_per_split)

    partials = pl.pallas_call(
        kernel,
        out_shape=jax.ShapeDtypeStruct((num_splits, 1), jnp.float32),
        grid_spec=pltpu.PrefetchScalarGridSpec(
            num_scalar_prefetch=0,
            grid=(num_splits, tiles_per_split),
            in_specs=[
                pl.BlockSpec((C, tile_n), idx_map),     # [C, TILE_N] in VMEM
                pl.BlockSpec((1, tile_n), idx_map),     # [1, TILE_N] int32 in VMEM
            ],
            out_specs=pl.BlockSpec((1, 1), lambda p, j: (p, 0),
                                   memory_space=pltpu.SMEM),
        ),
        compiler_params=pltpu.CompilerParams(
            dimension_semantics=("parallel", "arbitrary"),
            vmem_limit_bytes=32 * 1024 * 1024),
    )(inputs, target2d)
    return jnp.sum(partials)


def hinge_squared_ref(inputs, target):
    # pure-JAX reference mirroring the PyTorch module (f32 math)
    inputs = inputs.astype(jnp.float32)
    dims = inputs.shape[0]
    yhat_table = 2.0 * jnp.eye(dims, dtype=jnp.float32) - jnp.ones((dims, dims), jnp.float32)
    yhat = yhat_table[target.astype(jnp.int32)].T       # [C, N]
    h = jnp.maximum(0.5 - yhat * inputs, 0.0)
    return jnp.sum(h * h)


if __name__ == "__main__":
    dims = 19   # matches HingeSquared(dims=19)
    key = jax.random.PRNGKey(0)
    k1x, k1t, k2x, k2t, k3x, k3t = jax.random.split(key, 6)

    # Case 1: the module's intended small use (f32, [C=19, N=8]).
    # Single partial tile, no padding copy, single grid step.
    x1 = jax.random.normal(k1x, (dims, 8), dtype=jnp.float32)
    t1 = jax.random.randint(k1t, (8,), 0, dims, dtype=jnp.int32)
    loss1 = hinge_squared(x1, t1)
    jax.block_until_ready(loss1)
    ref1 = hinge_squared_ref(x1, t1)
    assert jnp.allclose(loss1, ref1, rtol=1e-5, atol=1e-5), (loss1, ref1)

    # Case 2: bf16 input, non-multiple-of-128 batch -> ragged-tail mask and
    # in-kernel bf16 -> f32 upcast (bf16 is DMA'd as-is from HBM).
    x2 = jax.random.normal(k2x, (dims, 1000), dtype=jnp.float32).astype(jnp.bfloat16)
    t2 = jax.random.randint(k2t, (1000,), 0, dims, dtype=jnp.int32)
    loss2 = hinge_squared(x2, t2)
    jax.block_until_ready(loss2)
    ref2 = hinge_squared_ref(x2, t2)   # ref upcasts the same bf16 values to f32
    assert jnp.allclose(loss2, ref2, rtol=1e-4, atol=1e-3), (loss2, ref2)

    # Case 3: force a multi-tile, two-split grid (tile_n=384 -> 3 real tiles,
    # 2x2 grid with one clamped+masked tile) to exercise the SMEM scalar
    # accumulation across steps, the clamped index_map, and the partial tail.
    x3 = jax.random.normal(k3x, (dims, 1000), dtype=jnp.float32)
    t3 = jax.random.randint(k3t, (1000,), 0, dims, dtype=jnp.int32)
    loss3 = hinge_squared(x3, t3, tile_n=384, num_splits=2)
    jax.block_until_ready(loss3)
    ref3 = hinge_squared_ref(x3, t3)
    assert jnp.allclose(loss3, ref3, rtol=1e-5, atol=1e-4), (loss3, ref3)

    print("KERNEL_OK")
</pallas_src>

<mosaic_0001>
module attributes {stable_mosaic.version = 11 : i64} {
  func.func @_hinge_squared_kernel(%arg0: i32, %arg1: i32, %arg2: memref<19x128xf32, #tpu.memory_space<vmem>>, %arg3: memref<1x128xi32, #tpu.memory_space<vmem>>, %arg4: memref<1x1xf32, #tpu.memory_space<smem>>) attributes {dimension_semantics = [#tpu.dimension_semantics<parallel>, #tpu.dimension_semantics<arbitrary>], iteration_bounds = array<i64: 1, 1>, scalar_prefetch = 0 : i64, scratch_operands = 0 : i64, tpu.core_type = #tpu.core_type<tc>, window_params = [{transform_indices = @transform_0, window_bounds = array<i64: 19, 128>}, {transform_indices = @transform_1, window_bounds = array<i64: 1, 128>}, {transform_indices = @transform_2, window_bounds = array<i64: 1, 1>}]} {
    %c0_i32 = arith.constant 0 : i32
    %0 = arith.cmpi eq, %arg1, %c0_i32 : i32
    %1 = arith.extui %0 : i1 to i32
    %c0_i32_0 = arith.constant 0 : i32
    %2 = arith.cmpi ne, %1, %c0_i32_0 : i32
    scf.if %2 {
      %cst_12 = arith.constant 0.000000e+00 : f32
      %c0_13 = arith.constant 0 : index
      %c0_14 = arith.constant 0 : index
      %35 = memref.load %arg4[%c0_13, %c0_14] : memref<1x1xf32, #tpu.memory_space<smem>>
      memref.store %cst_12, %arg4[%c0_13, %c0_14] : memref<1x1xf32, #tpu.memory_space<smem>>
    } else {
    }
    %c0 = arith.constant 0 : index
    %c0_1 = arith.constant 0 : index
    %3 = vector.load %arg2[%c0, %c0_1] : memref<19x128xf32, #tpu.memory_space<vmem>>, vector<19x128xf32>
    %c0_2 = arith.constant 0 : index
    %c0_3 = arith.constant 0 : index
    %4 = vector.load %arg3[%c0_2, %c0_3] : memref<1x128xi32, #tpu.memory_space<vmem>>, vector<1x128xi32>
    %5 = tpu.iota {dimensions = array<i32: 0>} : vector<19x128xi32>
    %6 = vector.broadcast %4 : vector<1x128xi32> to vector<19x128xi32>
    %7 = arith.cmpi eq, %5, %6 : vector<19x128xi32>
    %cst = arith.constant 5.000000e-01 : f32
    %8 = vector.broadcast %cst : f32 to vector<19x128xf32>
    %9 = arith.subf %8, %3 : vector<19x128xf32>
    %cst_4 = arith.constant 5.000000e-01 : f32
    %10 = vector.broadcast %cst_4 : f32 to vector<19x128xf32>
    %11 = arith.addf %10, %3 : vector<19x128xf32>
    %12 = arith.select %7, %9, %11 : vector<19x128xi1>, vector<19x128xf32>
    %cst_5 = arith.constant 0.000000e+00 : f32
    %13 = vector.broadcast %cst_5 : f32 to vector<19x128xf32>
    %14 = arith.maximumf %12, %13 : vector<19x128xf32>
    %15 = arith.mulf %14, %14 : vector<19x128xf32>
    %c1_i32 = arith.constant 1 : i32
    %16 = arith.muli %arg0, %c1_i32 : i32
    %17 = arith.addi %16, %arg1 : i32
    %c128_i32 = arith.constant 128 : i32
    %18 = arith.muli %17, %c128_i32 : i32
    %19 = tpu.iota {dimensions = array<i32: 1>} : vector<1x128xi32>
    %20 = vector.broadcast %18 : i32 to vector<1x128xi32>
    %21 = arith.addi %20, %19 : vector<1x128xi32>
    %c8_i32 = arith.constant 8 : i32
    %22 = vector.broadcast %c8_i32 : i32 to vector<1x128xi32>
    %23 = arith.cmpi slt, %21, %22 : vector<1x128xi32>
    %cst_6 = arith.constant 0.000000e+00 : f32
    %24 = vector.shape_cast %23 : vector<1x128xi1> to vector<1x128xi1>
    %25 = vector.broadcast %24 : vector<1x128xi1> to vector<19x128xi1>
    %26 = vector.broadcast %cst_6 : f32 to vector<19x128xf32>
    %27 = arith.select %25, %15, %26 : vector<19x128xi1>, vector<19x128xf32>
    %c0_7 = arith.constant 0 : index
    %c0_8 = arith.constant 0 : index
    %28 = memref.load %arg4[%c0_7, %c0_8] : memref<1x1xf32, #tpu.memory_space<smem>>
    %29 = vector.shape_cast %27 : vector<19x128xf32> to vector<1x19x128xf32>
    %cst_9 = arith.constant dense<0.000000e+00> : vector<1xf32>
    %30 = vector.multi_reduction <add>, %29, %cst_9 [1, 2] : vector<1x19x128xf32> to vector<1xf32>
    %31 = vector.shape_cast %30 : vector<1xf32> to vector<1x1x1xf32>
    %32 = vector.extract %31[0, 0, 0] : f32 from vector<1x1x1xf32>
    %33 = arith.addf %28, %32 : f32
    %c0_10 = arith.constant 0 : index
    %c0_11 = arith.constant 0 : index
    %34 = memref.load %arg4[%c0_10, %c0_11] : memref<1x1xf32, #tpu.memory_space<smem>>
    memref.store %33, %arg4[%c0_10, %c0_11] : memref<1x1xf32, #tpu.memory_space<smem>>
    return
  }
  func.func @transform_0(%arg0: i32, %arg1: i32) -> (i32, i32) {
    %c1_i32 = arith.constant 1 : i32
    %0 = arith.muli %arg0, %c1_i32 : i32
    %1 = arith.addi %0, %arg1 : i32
    %c0_i32 = arith.constant 0 : i32
    %2 = arith.minsi %1, %c0_i32 : i32
    %c0_i32_0 = arith.constant 0 : i32
    %c0_i32_1 = arith.constant 0 : i32
    return %c0_i32_0, %2 : i32, i32
  }
  func.func @transform_1(%arg0: i32, %arg1: i32) -> (i32, i32) {
    %c1_i32 = arith.constant 1 : i32
    %0 = arith.muli %arg0, %c1_i32 : i32
    %1 = arith.addi %0, %arg1 : i32
    %c0_i32 = arith.constant 0 : i32
    %2 = arith.minsi %1, %c0_i32 : i32
    %c0_i32_0 = arith.constant 0 : i32
    %c0_i32_1 = arith.constant 0 : i32
    return %c0_i32_0, %2 : i32, i32
  }
  func.func @transform_2(%arg0: i32, %arg1: i32) -> (i32, i32) {
    %c0_i32 = arith.constant 0 : i32
    %c0_i32_0 = arith.constant 0 : i32
    return %arg0, %c0_i32 : i32, i32
  }
}

</mosaic_0001>

<bundles_post_ra>
// kernel: tpu_custom_call.1
= control target key start
LH: loop header
LB: loop body
LE: loop exit
PB: predicated region body
PF: predicated region fallthrough
CT: control target
= control target key end

     0   :  { %v73_v3 = vlaneseq  ;;  %s199_s0 = inlined_call_operand.vmem [shape: f32[19,8], index: 0, kind: input, shape index: {}]   ;;  %s200_s1 = inlined_call_operand.vmem [shape: s32[1,8], index: 1, kind: input, shape index: {}]   ;;  %s201_s2 = inlined_call_operand.hbm [shape: f32[1,1], index: 2, kind: output, shape index: {}]  }
   0x1   :  { %v69_v0 = vld [vmem:[%s199_s0] sm:$0xff]  ;;  %v70_v1 = vld [vmem:[%s199_s0 + $0x8] sm:$0xff]  ;;  %v71_v2 = vld [vmem:[%s199_s0 + $0x10] sm:$0x7] }
   0x2   :  { %v153_v4 = vld [vmem:[%s200_s1] ss:$0 sm:$0xff]  ;;  %v81_v5 = vsub.f32 0.5, %v69_v0  ;;  %v74_v6 = vshrl.u32 %v73_v3, 7  ;;  %v82_v7 = vsub.f32 0.5, %v70_v1  ;;  %v84_v8 = vadd.f32 0.5, %v69_v0 }
   0x3   :  { %7 = vsyncpa [#allocation3], 0  ;;  %v83_v9 = vsub.f32 0.5, %v71_v2  ;;  %v85_v10 = vadd.f32 0.5, %v70_v1  ;;  %v86_v11 = vadd.f32 0.5, %v71_v2  ;;  %v99_v12 = vand.u32 127, %v73_v3 }
   0x4   :  { %v75_v13 = vadd.s32 8, %v74_v6  ;;  %v76_v14 = vadd.s32 16, %v74_v6  ;;  %vm78_vm0 = vcmp.eq.s32.totalorder %v74_v6, %v153_v4  ;;  %vm110_vm4 = vcmask 1042432   ;;  %s130_s17 = sshll.u32 %s201_s2, 4  ;;  %s168_s19 = smov [#allocation2]   ;;  %s131_s17 = int_to_ptr.hbm [resolvable:$true] %s130_s17 }
   0x5   :  { %v87_v15 = vsel %vm78_vm0, %v81_v5, %v84_v8  ;;  %vm102_vm3 = vcmp.lt.s32.totalorder %v99_v12, 8 }
   0x6   :  { %vm79_vm1 = vcmp.eq.s32.totalorder %v75_v13, %v153_v4  ;;  %vm80_vm2 = vcmp.eq.s32.totalorder %v76_v14, %v153_v4  ;;  %v90_v16 = vmax.f32 %v87_v15, 0.0 }
   0x7   :  { %v88_v17 = vsel %vm79_vm1, %v82_v7, %v85_v10  ;;  %v89_v18 = vsel %vm80_vm2, %v83_v9, %v86_v11 }
   0x8   :  { %v91_v19 = vmax.f32 %v88_v17, 0.0  ;;  %v92_v20 = vmax.f32 %v89_v18, 0.0  ;;  %v93_v21 = vmul.f32 %v90_v16, %v90_v16 }
   0xa   :  { %v94_v22 = vmul.f32 %v91_v19, %v91_v19  ;;  %v95_v23 = vmul.f32 %v92_v20, %v92_v20  ;;  %v105_v24 = vsel %vm102_vm3, %v93_v21, 0.0 }
   0xc   :  { %v106_v25 = vsel %vm102_vm3, %v94_v22, 0.0  ;;  %v107_v26 = vsel %vm102_vm3, %v95_v23, 0.0 }
   0xd   :  { %v109_v27 = vadd.f32 %v106_v25, %v105_v24  ;;  %v111_v28 = vsel %vm110_vm4, %v107_v26, 0.0 }
   0xf   :  { %v112_v29 = vadd.f32 %v111_v28, %v109_v27 }
  0x11   :  { %113 = vadd.xlane.f32.xlu0 %v112_v29 }
  0x84   :  { %v114_v30 = vpop.xlane.xlu0 %113 }
  0x85   :  { %v115_v31 = vrot.slane %v114_v30, 4 }
  0x87   :  { %v116_v32 = vadd.f32 %v115_v31, %v114_v30 }
  0x89   :  { %v117_v33 = vrot.slane %v116_v32, 2 }
  0x8b   :  { %v118_v34 = vadd.f32 %v117_v33, %v116_v32 }
  0x8d   :  { %v119_v35 = vrot.slane %v118_v34, 1 }
  0x8f   :  { %v120_v36 = vadd.f32 %v119_v35, %v118_v34 }
  0x91   :  { %149 = vpush %v120_v36 }
  0xc2   :  { %s150_s18 = spop %149 }
  0xc3   :  { %124 = sst [smem:[#allocation2]] %s150_s18 }
  0xc4   :  { %133 = dma.smem_to_hbm %s168_s19, 16, %s131_s17, [#allocation3]  }
  0xc5   :  { %166 = dma.done.wait [#allocation3], 16  }
  0xc6   :  { %167 = vsyncadd [#allocation3], 4294967280 }
  0xc7   :  { %138 = sfence }
  0xc8   :  { %139 = vsyncpa [#allocation3], 1 }

</bundles_post_ra>
